<compile_context>
chip_gen: v6e
topology: v6e:2x2x1
jax: 0.10.0
libtpu: 0.0.40
codegen_flags: <defaults>
</compile_context>

<pallas_src>
import functools

import jax
import jax.numpy as jnp
from jax.experimental import pallas as pl
from jax.experimental.pallas import tpu as pltpu


def _round_up(x, m):
    return ((x + m - 1) // m) * m


def _mlp_kernel(x_ref, w1_ref, b1_ref, w2_ref, b2_ref, o_ref):
    # Cast (if any) happens in-kernel so no extra XLA pass over x is needed.
    x = x_ref[...].astype(w1_ref.dtype)
    # fc1: [TB, Cin] @ [Cin, Hp] -> f32 accumulate on the MXU.
    h = jnp.dot(x, w1_ref[...], preferred_element_type=jnp.float32)
    # Bias + ReLU in f32 on the VPU (biases are always kept f32).
    h = jnp.maximum(h + b1_ref[...], 0.0)
    # fc2: [TB, Hp] @ [Hp, Cout] -> f32 accumulate; hidden never leaves vregs.
    y = jnp.dot(h.astype(w2_ref.dtype), w2_ref[...],
                preferred_element_type=jnp.float32)
    o_ref[...] = (y + b2_ref[...]).astype(o_ref.dtype)


def prepare_params(w1, b1, w2, b2, *, matmul_dtype=jnp.float32):
    """One-time parameter prep (hoisted out of the per-call path).

    Pads the hidden axis to a lane-dense 128 (numerically exact: zero columns
    through bias=0 and ReLU contribute exactly 0) and casts the weights to the
    requested matmul dtype.  Biases stay f32.
    """
    in_ch, hidden = w1.shape
    out_ch = w2.shape[1]
    hp = _round_up(hidden, 128)

    w1p = jnp.zeros((in_ch, hp), matmul_dtype).at[:, :hidden].set(
        w1.astype(matmul_dtype))
    b1p = jnp.zeros((1, hp), jnp.float32).at[:, :hidden].set(
        b1.reshape(1, hidden).astype(jnp.float32))
    w2p = jnp.zeros((hp, out_ch), matmul_dtype).at[:hidden, :].set(
        w2.astype(matmul_dtype))
    b2p = b2.reshape(1, out_ch).astype(jnp.float32)
    return w1p, b1p, w2p, b2p


@functools.partial(jax.jit, static_argnames=("batch_tile",))
def embedding_network_forward(x, w1p, b1p, w2p, b2p, *, batch_tile=4096):
    """Fused Linear->ReLU->Linear forward.

    x  : [..., in_channels] (leading dims flattened, like nn.Linear)
    w1p: [in_channels, hidden_padded]  (from prepare_params)
    b1p: [1, hidden_padded]            (f32)
    w2p: [hidden_padded, out_channels]
    b2p: [1, out_channels]             (f32)
    """
    orig_shape = x.shape
    in_ch, hp = w1p.shape
    out_ch = w2p.shape[1]
    out_dtype = x.dtype

    x2d = x.reshape(-1, in_ch)
    batch = x2d.shape[0]

    # Batch tile: sublane-aligned, no explicit padding of x (Pallas masks the
    # partial last block).  Keep >= 2 grid steps when the batch is splittable
    # so v7x's second TensorCore gets work under ("parallel",).
    tb = min(batch_tile, _round_up(batch, 8))
    if batch >= 16:
        tb = min(tb, _round_up(-(-batch // 2), 8))
    grid = (pl.cdiv(batch, tb),)

    flops = 2 * batch * (in_ch * hp + hp * out_ch)
    bytes_accessed = (
        x2d.size * x2d.dtype.itemsize
        + w1p.size * w1p.dtype.itemsize + w2p.size * w2p.dtype.itemsize
        + b1p.size * b1p.dtype.itemsize + b2p.size * b2p.dtype.itemsize
        + batch * out_ch * jnp.dtype(out_dtype).itemsize)

    out = pl.pallas_call(
        _mlp_kernel,
        out_shape=jax.ShapeDtypeStruct((batch, out_ch), out_dtype),
        grid=grid,
        in_specs=[
            pl.BlockSpec((tb, in_ch), lambda i: (i, 0)),    # x tile per step
            pl.BlockSpec((in_ch, hp), lambda i: (0, 0)),    # w1 resident
            pl.BlockSpec((1, hp), lambda i: (0, 0)),        # b1 resident
            pl.BlockSpec((hp, out_ch), lambda i: (0, 0)),   # w2 resident
            pl.BlockSpec((1, out_ch), lambda i: (0, 0)),    # b2 resident
        ],
        out_specs=pl.BlockSpec((tb, out_ch), lambda i: (i, 0)),  # true width
        compiler_params=pltpu.CompilerParams(
            dimension_semantics=("parallel",)),
        cost_estimate=pl.CostEstimate(
            flops=flops, transcendentals=0, bytes_accessed=bytes_accessed),
    )(x2d, w1p, b1p, w2p, b2p)

    return out.reshape(*orig_shape[:-1], out_ch)


def init_params(key, in_channels=26, hidden=50, out_channels=20,
                dtype=jnp.float32):
    """Deterministic init mimicking nn.Linear (uniform +-1/sqrt(fan_in))."""
    k1, k2, k3, k4 = jax.random.split(key, 4)
    bound1 = 1.0 / (in_channels ** 0.5)
    bound2 = 1.0 / (hidden ** 0.5)
    w1 = jax.random.uniform(k1, (in_channels, hidden), dtype,
                            minval=-bound1, maxval=bound1)
    b1 = jax.random.uniform(k2, (1, hidden), dtype,
                            minval=-bound1, maxval=bound1)
    w2 = jax.random.uniform(k3, (hidden, out_channels), dtype,
                            minval=-bound2, maxval=bound2)
    b2 = jax.random.uniform(k4, (1, out_channels), dtype,
                            minval=-bound2, maxval=bound2)
    return w1, b1, w2, b2


if __name__ == "__main__":
    key = jax.random.PRNGKey(0)
    kx, kx2, kp = jax.random.split(key, 3)

    in_channels, hidden, out_channels = 26, 50, 20
    w1, b1, w2, b2 = init_params(kp, in_channels, hidden, out_channels)

    # Pure-JAX reference (same math as the PyTorch module, f32 throughout).
    def ref_fn(xx):
        return jnp.maximum(xx @ w1 + b1, 0.0) @ w2 + b2

    # One-time parameter prep (hoisted out of the forward path).
    params_f32 = prepare_params(w1, b1, w2, b2, matmul_dtype=jnp.float32)
    params_bf16 = prepare_params(w1, b1, w2, b2, matmul_dtype=jnp.bfloat16)

    # 1) Small 2-D batch, f32 path.
    x = jax.random.normal(kx, (8, in_channels), dtype=jnp.float32)
    y = jax.block_until_ready(embedding_network_forward(x, *params_f32))
    assert y.shape == (8, out_channels)
    assert jnp.allclose(y, ref_fn(x), atol=1e-5, rtol=1e-5)

    # 2) 3-D input whose flattened batch (14) is not a multiple of the tile:
    #    exercises leading-dim flattening and the masked partial last block.
    x3 = jax.random.normal(kx2, (2, 7, in_channels), dtype=jnp.float32)
    y3 = jax.block_until_ready(embedding_network_forward(x3, *params_f32))
    assert y3.shape == (2, 7, out_channels)
    ref3 = ref_fn(x3.reshape(-1, in_channels)).reshape(2, 7, out_channels)
    assert jnp.allclose(y3, ref3, atol=1e-5, rtol=1e-5)

    # 3) bf16-weights path (f32 MXU accumulation): looser tolerance.
    y16 = jax.block_until_ready(embedding_network_forward(x, *params_bf16))
    assert y16.shape == (8, out_channels)
    assert jnp.allclose(y16, ref_fn(x), atol=5e-2, rtol=5e-2)

    print("KERNEL_OK")
</pallas_src>

<mosaic_0001>
module attributes {stable_mosaic.version = 11 : i64} {
  func.func @_mlp_kernel(%arg0: i32, %arg1: memref<8x26xf32, #tpu.memory_space<vmem>>, %arg2: memref<26x128xf32, #tpu.memory_space<vmem>>, %arg3: memref<1x128xf32, #tpu.memory_space<vmem>>, %arg4: memref<128x20xf32, #tpu.memory_space<vmem>>, %arg5: memref<1x20xf32, #tpu.memory_space<vmem>>, %arg6: memref<8x20xf32, #tpu.memory_space<vmem>>) attributes {dimension_semantics = [#tpu.dimension_semantics<parallel>], iteration_bounds = array<i64: 1>, scalar_prefetch = 0 : i64, scratch_operands = 0 : i64, tpu.core_type = #tpu.core_type<tc>, window_params = [{transform_indices = @transform_0, window_bounds = array<i64: 8, 26>}, {pipeline_mode = #tpu.pipeline_mode<synchronous>, transform_indices = @transform_1, window_bounds = array<i64: 26, 128>}, {pipeline_mode = #tpu.pipeline_mode<synchronous>, transform_indices = @transform_2, window_bounds = array<i64: 1, 128>}, {pipeline_mode = #tpu.pipeline_mode<synchronous>, transform_indices = @transform_3, window_bounds = array<i64: 128, 20>}, {pipeline_mode = #tpu.pipeline_mode<synchronous>, transform_indices = @transform_4, window_bounds = array<i64: 1, 20>}, {transform_indices = @transform_5, window_bounds = array<i64: 8, 20>}]} {
    %c0 = arith.constant 0 : index
    %c0_0 = arith.constant 0 : index
    %0 = vector.load %arg1[%c0, %c0_0] : memref<8x26xf32, #tpu.memory_space<vmem>>, vector<8x26xf32>
    %c0_1 = arith.constant 0 : index
    %c0_2 = arith.constant 0 : index
    %1 = vector.load %arg2[%c0_1, %c0_2] : memref<26x128xf32, #tpu.memory_space<vmem>>, vector<26x128xf32>
    %cst = arith.constant dense<0.000000e+00> : vector<8x128xf32>
    %2 = tpu.matmul %0, %1, %cst {dimension_numbers = #tpu.dot_dimension_numbers<[1], [0], [0], [1], [0, 0, 1, 1], [], []>} : vector<8x26xf32>, vector<26x128xf32>, vector<8x128xf32> -> vector<8x128xf32>
    %c0_3 = arith.constant 0 : index
    %c0_4 = arith.constant 0 : index
    %3 = vector.load %arg3[%c0_3, %c0_4] : memref<1x128xf32, #tpu.memory_space<vmem>>, vector<1x128xf32>
    %4 = vector.broadcast %3 : vector<1x128xf32> to vector<8x128xf32>
    %5 = arith.addf %2, %4 : vector<8x128xf32>
    %cst_5 = arith.constant 0.000000e+00 : f32
    %6 = vector.broadcast %cst_5 : f32 to vector<8x128xf32>
    %7 = arith.maximumf %5, %6 : vector<8x128xf32>
    %c0_6 = arith.constant 0 : index
    %c0_7 = arith.constant 0 : index
    %8 = vector.load %arg4[%c0_6, %c0_7] : memref<128x20xf32, #tpu.memory_space<vmem>>, vector<128x20xf32>
    %cst_8 = arith.constant dense<0.000000e+00> : vector<8x20xf32>
    %9 = tpu.matmul %7, %8, %cst_8 {dimension_numbers = #tpu.dot_dimension_numbers<[1], [0], [0], [1], [0, 0, 1, 1], [], []>} : vector<8x128xf32>, vector<128x20xf32>, vector<8x20xf32> -> vector<8x20xf32>
    %c0_9 = arith.constant 0 : index
    %c0_10 = arith.constant 0 : index
    %10 = vector.load %arg5[%c0_9, %c0_10] : memref<1x20xf32, #tpu.memory_space<vmem>>, vector<1x20xf32>
    %11 = vector.broadcast %10 : vector<1x20xf32> to vector<8x20xf32>
    %12 = arith.addf %9, %11 : vector<8x20xf32>
    %c0_11 = arith.constant 0 : index
    %c0_12 = arith.constant 0 : index
    %13 = vector.load %arg6[%c0_11, %c0_12] : memref<8x20xf32, #tpu.memory_space<vmem>>, vector<8x20xf32>
    tpu.vector_store %arg6[%c0_11, %c0_12], %12 {strides = array<i32>} : memref<8x20xf32, #tpu.memory_space<vmem>>, vector<8x20xf32>,
    return
  }
  func.func @transform_0(%arg0: i32) -> (i32, i32) {
    %c0_i32 = arith.constant 0 : i32
    %c0_i32_0 = arith.constant 0 : i32
    return %arg0, %c0_i32 : i32, i32
  }
  func.func @transform_1(%arg0: i32) -> (i32, i32) {
    %c0_i32 = arith.constant 0 : i32
    %c0_i32_0 = arith.constant 0 : i32
    %c0_i32_1 = arith.constant 0 : i32
    return %c0_i32, %c0_i32_0 : i32, i32
  }
  func.func @transform_2(%arg0: i32) -> (i32, i32) {
    %c0_i32 = arith.constant 0 : i32
    %c0_i32_0 = arith.constant 0 : i32
    %c0_i32_1 = arith.constant 0 : i32
    return %c0_i32, %c0_i32_0 : i32, i32
  }
  func.func @transform_3(%arg0: i32) -> (i32, i32) {
    %c0_i32 = arith.constant 0 : i32
    %c0_i32_0 = arith.constant 0 : i32
    %c0_i32_1 = arith.constant 0 : i32
    return %c0_i32, %c0_i32_0 : i32, i32
  }
  func.func @transform_4(%arg0: i32) -> (i32, i32) {
    %c0_i32 = arith.constant 0 : i32
    %c0_i32_0 = arith.constant 0 : i32
    %c0_i32_1 = arith.constant 0 : i32
    return %c0_i32, %c0_i32_0 : i32, i32
  }
  func.func @transform_5(%arg0: i32) -> (i32, i32) {
    %c0_i32 = arith.constant 0 : i32
    %c0_i32_0 = arith.constant 0 : i32
    return %arg0, %c0_i32 : i32, i32
  }
}

</mosaic_0001>

<bundles_post_ra>
// kernel: embedding_network_forward.1
= control target key start
LH: loop header
LB: loop body
LE: loop exit
PB: predicated region body
PF: predicated region fallthrough
CT: control target
= control target key end

     0   :  { %vm37_vm0 = vcmask 1041408   ;;  %v318_v1 = vmov 0.0   ;;  %vm319_vm1 = vmmov 0   ;;  %vm33_vm2 = vcmask 211968   ;;  %s447_s0 = inlined_call_operand.vmem [shape: f32[8,26], index: 0, kind: input, shape index: {}]   ;;  %s448_s1 = inlined_call_operand.vmem [shape: f32[26,128], index: 1, kind: input, shape index: {}]   ;;  %s449_s2 = inlined_call_operand.vmem [shape: f32[1,128], index: 2, kind: input, shape index: {}]   ;;  %s450_s3 = inlined_call_operand.vmem [shape: f32[128,20], index: 3, kind: input, shape index: {}]   ;;  %s451_s4 = inlined_call_operand.vmem [shape: f32[1,20], index: 4, kind: input, shape index: {}]   ;;  %s452_s5 = inlined_call_operand.hbm [shape: f32[8,20], index: 5, kind: output, shape index: {}]  }
   0x1   :  { %v25_v0 = vld [vmem:[%s448_s1 + $0x18] sm:$0x3]  ;;  %247 = vmatprep.subr.mxu0 %v318_v1  ;;  %v24_v2 = vld [vmem:[%s448_s1 + $0x10] sm:$0xff]  ;;  %258 = vmatprep.subr.mxu1 %v318_v1  ;;  %v23_v5 = vld [vmem:[%s448_s1 + $0x8] sm:$0xff] }
   0x2   :  { %v127_v3 = vld [vmem:[%s450_s3 + $0x78] sm:$0xff]  ;;  %248 = vmatpush3.msk.msra.mxu0 %vm37_vm0, %v25_v0  ;;  %255 = vmatprep.mubr.msk.f32.mxu0 %vm319_vm1, %v318_v1  ;;  %v126_v4 = vld [vmem:[%s450_s3 + $0x70] sm:$0xff]  ;;  %v125_v6 = vld [vmem:[%s450_s3 + $0x68] sm:$0xff] }
   0x3   :  { %249 = vmatprep.subr.mxu0 %v318_v1  ;;  %259 = vmatpush3.msra.mxu1 %v127_v3  ;;  %v22_v7 = vld [vmem:[%s448_s1] sm:$0xff] }
   0x4   :  { %250 = vmatpush3.msra.mxu0 %v24_v2  ;;  %260 = vmatprep.subr.mxu1 %v318_v1  ;;  %v21_v8 = vld [vmem:[%s447_s0] sm:$0xff] }
   0x5   :  { %251 = vmatprep.subr.mxu0 %v318_v1  ;;  %261 = vmatpush3.msra.mxu1 %v126_v4  ;;  %v124_v9 = vld [vmem:[%s450_s3 + $0x60] sm:$0xff] }
   0x6   :  { %252 = vmatpush3.msra.mxu0 %v23_v5  ;;  %262 = vmatprep.subr.mxu1 %v318_v1 }
   0x7   :  { %10 = vsyncpa [#allocation3], 0  ;;  %253 = vmatprep.subr.mxu0 %v318_v1  ;;  %263 = vmatpush3.msra.mxu1 %v125_v6  ;;  %v123_v10 = vld [vmem:[%s450_s3 + $0x58] sm:$0xff]  ;;  %v122_v11 = vld [vmem:[%s450_s3 + $0x50] sm:$0xff]  ;;  %s320_s11 = smov [#allocation2]   ;;  %vm205_vm3 = vcmask 162816  }
   0x8   :  { %254 = vmatpush3.msra.mxu0 %v22_v7  ;;  %264 = vmatprep.subr.mxu1 %v318_v1  ;;  %v121_v12 = vld [vmem:[%s450_s3 + $0x48] sm:$0xff]  ;;  %v120_v13 = vld [vmem:[%s450_s3 + $0x40] sm:$0xff]  ;;  %v119_v14 = vld [vmem:[%s450_s3 + $0x38] sm:$0xff]  ;;  %s213_s0 = sshll.u32 %s320_s11, 4  ;;  %s214_s0 = int_to_ptr.vmem [resolvable:$true] %s213_s0 }
   0x9   :  { %256 = vmatmul.mubr.msk.f32.vlgmr.msra.gmra.mxu0 %vm33_vm2, %v21_v8  ;;  %265 = vmatpush3.msra.mxu1 %v124_v9  ;;  %v118_v15 = vld [vmem:[%s450_s3 + $0x30] sm:$0xff]  ;;  %v117_v16 = vld [vmem:[%s450_s3 + $0x28] sm:$0xff]  ;;  %v116_v17 = vld [vmem:[%s450_s3 + $0x20] sm:$0xff]  ;;  %p301_p1 = scmp.lt.s32.totalorder %s214_s0, %s214_s0 }
   0xa   :  { %266 = vmatprep.subr.mxu1 %v318_v1  ;;  %290 = vmatprep.mubr.msk.f32.mxu1 %vm319_vm1, %v318_v1  ;;  %v115_v18 = vld [vmem:[%s450_s3 + $0x18] sm:$0xff]  ;;  %v114_v19 = vld [vmem:[%s450_s3 + $0x10] sm:$0xff]  ;;  %v113_v20 = vld [vmem:[%s450_s3 + $0x8] sm:$0xff] }
   0xb   :  { %267 = vmatpush3.msra.mxu1 %v123_v10  ;;  %v112_v21 = vld [vmem:[%s450_s3] sm:$0xff]  ;;  %s296_s3 = scalar_lea.vmem %s214_s0, 128 }
   0xc   :  { %268 = vmatprep.subr.mxu1 %v318_v1  ;;  %v221_v22 = vld [vmem:[%s449_s2] ss:$0 sm:$0xff]  ;;  %p297_p0 = scmp.ne.s32.totalorder %s214_s0, %s296_s3  ;;  %p302_p2 = scmp.lt.s32.totalorder %s296_s3, %s296_s3 }
   0xd   :  { %269 = vmatpush3.msra.mxu1 %v122_v11  ;;  %v224_v27 = vld [vmem:[%s451_s4] ss:$0 sm:$0xff] }
   0xe   :  { %270 = vmatprep.subr.mxu1 %v318_v1  ;;  %p303_p3 = por %p302_p2, %p301_p1 }
   0xf   :  { %271 = vmatpush3.msra.mxu1 %v121_v12 }
  0x10   :  { %272 = vmatprep.subr.mxu1 %v318_v1  ;;  %p304_p4 = pnand %p303_p3, %p297_p0 }
  0x11   :  { %273 = vmatpush3.msra.mxu1 %v120_v13 }
  0x12   :  { %274 = vmatprep.subr.mxu1 %v318_v1 }
  0x13   :  { %275 = vmatpush3.msra.mxu1 %v119_v14 }
  0x14   :  { %276 = vmatprep.subr.mxu1 %v318_v1 }
  0x15   :  { %277 = vmatpush3.msra.mxu1 %v118_v15 }
  0x16   :  { %278 = vmatprep.subr.mxu1 %v318_v1 }
  0x17   :  { %279 = vmatpush3.msra.mxu1 %v117_v16 }
  0x18   :  { %280 = vmatprep.subr.mxu1 %v318_v1 }
  0x19   :  { %281 = vmatpush3.msra.mxu1 %v116_v17 }
  0x1a   :  { %282 = vmatprep.subr.mxu1 %v318_v1 }
  0x1b   :  { %283 = vmatpush3.msra.mxu1 %v115_v18 }
  0x1c   :  { %284 = vmatprep.subr.mxu1 %v318_v1 }
  0x1d   :  { %285 = vmatpush3.msra.mxu1 %v114_v19 }
  0x1e   :  { %286 = vmatprep.subr.mxu1 %v318_v1 }
  0x1f   :  { %287 = vmatpush3.msra.mxu1 %v113_v20 }
  0x20   :  { %288 = vmatprep.subr.mxu1 %v318_v1 }
  0x21   :  { %289 = vmatpush3.msra.mxu1 %v112_v21 }
  0xc9   :  { %v107_v23 = vpop.f32.mrf.mxu0 }
  0xca   :  { %v108_v24 = vadd.f32 %v221_v22, %v107_v23 }
  0xcb   :  { %v257_v25 = vpop.f32.mrf.mxu0 }
  0xcc   :  { %v111_v26 = vmax.f32 %v108_v24, 0.0 }
  0xce   :  { %291 = vmatmul.mubr.f32.vlgmr.msra.gmra.mxu1 %v111_v26 }
 0x18e   :  { %v201_v28 = vpop.f32.mrf.mxu1 }
 0x18f   :  { %v202_v29 = vadd.f32 %v224_v27, %v201_v28 }
 0x190   :  { %v292_v30 = vpop.f32.mrf.mxu1 }
 0x191   :  { %206 = vst.msk [vmem:[#allocation2] sm:$0xff] %vm205_vm3, %v202_v29 }
 0x192   :  { %307 = shalt.err (!%p304_p4)
}
 0x193   :  { %216 = dma.vmem_to_hbm [thread:$0]  %s214_s0, 128, %s452_s5, [#allocation3]  }
 0x194   :  { %316 = dma.done.wait [#allocation3], 128  }
 0x195   :  { %317 = vsyncadd [#allocation3], 4294967168 }
 0x196   :  { %220 = vsyncpa [#allocation3], 1 }

</bundles_post_ra>
